<compile_context>
chip_gen: v7x
topology: tpu7x:2x2x1
jax: 0.10.0
libtpu: 0.0.40
codegen_flags: <defaults>
</compile_context>

<pallas_src>
import functools
import math

import jax
import jax.numpy as jnp
from jax.experimental import pallas as pl
from jax.experimental.pallas import tpu as pltpu


def _attention1d_kernel(x_ref, w1t_ref, w2t_ref, b2_ref, o_ref, acc_ref, *,
                        temperature, total_len, tile_len):
    # x_ref:   (TB, C, TILE)  native-dtype block of the input
    # w1t_ref: (C, hidden)    fc1 weight, transposed (no bias)
    # w2t_ref: (hidden, K)    fc2 weight, transposed
    # b2_ref:  (1, K)         fc2 bias
    # o_ref:   (TB, K)        softmax output block for this batch tile
    # acc_ref: (TB, C) f32    running spatial sum (pooling accumulator)
    l = pl.program_id(1)
    nl = pl.num_programs(1)

    @pl.when(l == 0)
    def _init():
        acc_ref[...] = jnp.zeros_like(acc_ref)

    def _accumulate(mask_tail):
        # f32 cast kept: accumulation is f32 and v5e has no bf16 VALU; the
        # kernel is HBM-bound so this is free filler on v6e/v7x.
        x_tile = x_ref[...].astype(jnp.float32)               # (TB, C, TILE)
        if mask_tail:
            # Ragged last tile: OOB block data is unspecified, mask it out.
            pos = l * tile_len + jax.lax.broadcasted_iota(
                jnp.int32, x_tile.shape, 2)
            x_tile = jnp.where(pos < total_len, x_tile, 0.0)
        # VPU/XLU partial reduction over the lane axis (no N=1 MXU matmul).
        acc_ref[...] += jnp.sum(x_tile, axis=-1)               # (TB, C)

    if total_len % tile_len != 0:
        # Mask work only on the last spatial step.
        @pl.when(l < nl - 1)
        def _bulk():
            _accumulate(False)

        @pl.when(l == nl - 1)
        def _tail():
            _accumulate(True)
    else:
        _accumulate(False)

    @pl.when(l == nl - 1)
    def _epilogue():
        # AdaptiveAvgPool1d(1): divide the accumulated sum by the true length.
        pooled = acc_ref[...] * (1.0 / total_len)               # (TB, C)
        # fc1 (1x1 conv == matmul, bias=False) + ReLU, batched over TB rows.
        h = jnp.dot(pooled, w1t_ref[...],
                    preferred_element_type=jnp.float32)         # (TB, hidden)
        h = jnp.maximum(h, 0.0)
        # fc2 (1x1 conv == matmul) + bias.
        z = jnp.dot(h, w2t_ref[...],
                    preferred_element_type=jnp.float32) + b2_ref[...]  # (TB, K)
        # softmax(z / temperature) over K (lane axis), numerically stable.
        z = z * (1.0 / temperature)
        z = z - jnp.max(z, axis=-1, keepdims=True)
        e = jnp.exp(z)
        p = e / jnp.sum(e, axis=-1, keepdims=True)
        o_ref[...] = p.astype(o_ref.dtype)


def _choose_tiles(B, C, L, itemsize, block_budget_bytes):
    """Pick (batch_tile, spatial_tile) so each x block is MiB-scale (amortizes
    the ~0.35us per-grid-step overhead) while double-buffered blocks stay
    inside every generation's default scoped VMEM."""
    LANE = 128
    row_bytes = C * L * itemsize
    # Whole input fits one block: collapse the grid to a single step.
    if B * row_bytes <= block_budget_bytes:
        return B, L
    # Full spatial rows, block the batch axis (TB a multiple of 8 keeps the
    # (TB, K) output block sublane-legal and packs sublanes when C is small).
    if 8 * row_bytes <= block_budget_bytes:
        tb = (block_budget_bytes // row_bytes) // 8 * 8
        return min(tb, B), L
    # Tile the spatial axis lane-aligned; batch tile is B or a multiple of 8.
    tb = B if B <= 8 else 8
    per_col = tb * C * itemsize
    tile = max(LANE, (block_budget_bytes // per_col) // LANE * LANE)
    tile = min(tile, L)
    return tb, tile


def attention1d_forward(x, w1, w2, b2, temperature,
                        block_budget_bytes=4 * 1024 * 1024):
    """x: (B, C, L) in its native float dtype (bf16/f32).
    w1: (hidden, C, 1) fc1 weight (bias-free); w2: (K, hidden, 1); b2: (K,).
    Returns (B, K) float32 softmax attention weights."""
    B, C, L = x.shape
    hidden = w1.shape[0]
    K = w2.shape[0]

    tb, tile = _choose_tiles(B, C, L, x.dtype.itemsize, block_budget_bytes)
    nb = pl.cdiv(B, tb)
    nl = pl.cdiv(L, tile)

    # Tiny parameter reshapes only (no full-tensor copies of x).
    w1t = w1.reshape(hidden, C).T.astype(jnp.float32)       # (C, hidden)
    w2t = w2.reshape(K, hidden).T.astype(jnp.float32)       # (hidden, K)
    b2r = b2.reshape(1, K).astype(jnp.float32)

    kernel = functools.partial(
        _attention1d_kernel,
        temperature=float(temperature),
        total_len=L,
        tile_len=tile,
    )

    bytes_accessed = (x.size * x.dtype.itemsize
                      + (w1t.size + w2t.size + b2r.size + B * K) * 4)
    cost = pl.CostEstimate(
        flops=2 * B * C * L + 2 * B * hidden * C + 2 * B * K * hidden,
        transcendentals=B * K,
        bytes_accessed=bytes_accessed,
    )

    out = pl.pallas_call(
        kernel,
        out_shape=jax.ShapeDtypeStruct((B, K), jnp.float32),
        grid_spec=pltpu.PrefetchScalarGridSpec(
            num_scalar_prefetch=0,
            grid=(nb, nl),
            in_specs=[
                pl.BlockSpec((tb, C, tile), lambda b, l: (b, 0, l)),
                pl.BlockSpec((C, hidden), lambda b, l: (0, 0)),
                pl.BlockSpec((hidden, K), lambda b, l: (0, 0)),
                pl.BlockSpec((1, K), lambda b, l: (0, 0)),
            ],
            out_specs=pl.BlockSpec((tb, K), lambda b, l: (b, 0)),
            scratch_shapes=[pltpu.VMEM((tb, C), jnp.float32)],
        ),
        compiler_params=pltpu.CompilerParams(
            dimension_semantics=("parallel", "arbitrary")),
        cost_estimate=cost,
    )(x, w1t, w2t, b2r)

    return out


def init_attention1d_params(key, in_planes, ratios, K):
    """Matches attention1d._initialize_weights: kaiming_normal_(fan_out, relu)
    for Conv1d weights, zero bias for fc2 (fc1 has no bias)."""
    if in_planes != 3:
        hidden_planes = int(in_planes * ratios) + 1
    else:
        hidden_planes = K

    k1, k2 = jax.random.split(key)

    # fc1 weight: (hidden, in_planes, 1), fan_out = hidden * 1
    std1 = math.sqrt(2.0 / hidden_planes)
    w1 = std1 * jax.random.normal(k1, (hidden_planes, in_planes, 1),
                                  dtype=jnp.float32)
    # fc2 weight: (K, hidden, 1), fan_out = K * 1
    std2 = math.sqrt(2.0 / K)
    w2 = std2 * jax.random.normal(k2, (K, hidden_planes, 1),
                                  dtype=jnp.float32)
    b2 = jnp.zeros((K,), dtype=jnp.float32)
    return w1, w2, b2


def _reference_forward(x, w1, w2, b2, temperature):
    """Pure-JAX reference (f32) for correctness checking."""
    B, C, L = x.shape
    hidden, K = w1.shape[0], w2.shape[0]
    pooled = jnp.mean(x.astype(jnp.float32), axis=2)              # (B, C)
    h = jnp.maximum(pooled @ w1.reshape(hidden, C).T, 0.0)        # fc1, no bias
    z = (h @ w2.reshape(K, hidden).T + b2) / temperature          # (B, K)
    return jax.nn.softmax(z, axis=1)


def _check(out, ref, B, K):
    assert out.shape == (B, K)
    assert jnp.allclose(out, ref, atol=1e-4, rtol=1e-4)
    assert jnp.allclose(jnp.sum(out, axis=1), 1.0, atol=1e-5)


if __name__ == "__main__":
    key = jax.random.PRNGKey(0)
    kx1, kp1, kx2, kp2, kx3, kp3 = jax.random.split(key, 6)

    # Config 1: attention1d(in_planes=4, ratios=0.25, K=4, temperature=4),
    # bf16 input; whole input fits one block -> single grid step.
    in_planes, ratios, K, temperature = 4, 0.25, 4, 4
    assert temperature % 3 == 1
    B, L = 2, 1024
    x = jax.random.normal(kx1, (B, in_planes, L),
                          dtype=jnp.float32).astype(jnp.bfloat16)
    w1, w2, b2 = init_attention1d_params(kp1, in_planes, ratios, K)
    out = jax.block_until_ready(attention1d_forward(x, w1, w2, b2, temperature))
    ref = _reference_forward(x, w1, w2, b2, temperature)
    _check(out, ref, B, K)

    # Config 2: in_planes == 3 branch (hidden = K), f32 input, non-aligned L
    # handled as a single full block.
    in_planes2, ratios2, K2, temperature2 = 3, 0.25, 4, 4
    B2, L2 = 2, 200
    x2 = jax.random.normal(kx2, (B2, in_planes2, L2), dtype=jnp.float32)
    w1b, w2b, b2b = init_attention1d_params(kp2, in_planes2, ratios2, K2)
    out2 = jax.block_until_ready(
        attention1d_forward(x2, w1b, w2b, b2b, temperature2))
    ref2 = _reference_forward(x2, w1b, w2b, b2b, temperature2)
    _check(out2, ref2, B2, K2)

    # Config 3: force the spatial-tiling + ragged-last-tile path (tiny block
    # budget) so the multi-step accumulation / tail mask is exercised.
    in_planes3, ratios3, K3, temperature3 = 4, 0.25, 4, 4
    B3, L3 = 2, 200
    x3 = jax.random.normal(kx3, (B3, in_planes3, L3),
                           dtype=jnp.float32).astype(jnp.bfloat16)
    w1c, w2c, b2c = init_attention1d_params(kp3, in_planes3, ratios3, K3)
    out3 = jax.block_until_ready(
        attention1d_forward(x3, w1c, w2c, b2c, temperature3,
                            block_budget_bytes=2048))
    ref3 = _reference_forward(x3, w1c, w2c, b2c, temperature3)
    _check(out3, ref3, B3, K3)

    print("KERNEL_OK")
</pallas_src>

<mosaic_0001>
module attributes {stable_mosaic.version = 11 : i64} {
  func.func @_attention1d_kernel(%arg0: i32, %arg1: i32, %arg2: memref<2x4x1024xbf16, #tpu.memory_space<vmem>>, %arg3: memref<4x2xf32, #tpu.memory_space<vmem>>, %arg4: memref<2x4xf32, #tpu.memory_space<vmem>>, %arg5: memref<1x4xf32, #tpu.memory_space<vmem>>, %arg6: memref<2x4xf32, #tpu.memory_space<vmem>>, %arg7: memref<2x4xf32, #tpu.memory_space<vmem>>) attributes {dimension_semantics = [#tpu.dimension_semantics<parallel>, #tpu.dimension_semantics<arbitrary>], iteration_bounds = array<i64: 1, 1>, scalar_prefetch = 0 : i64, scratch_operands = 1 : i64, tpu.core_type = #tpu.core_type<tc>, window_params = [{transform_indices = @transform_0, window_bounds = array<i64: 2, 4, 1024>}, {pipeline_mode = #tpu.pipeline_mode<synchronous>, transform_indices = @transform_1, window_bounds = array<i64: 4, 2>}, {pipeline_mode = #tpu.pipeline_mode<synchronous>, transform_indices = @transform_2, window_bounds = array<i64: 2, 4>}, {pipeline_mode = #tpu.pipeline_mode<synchronous>, transform_indices = @transform_3, window_bounds = array<i64: 1, 4>}, {transform_indices = @transform_4, window_bounds = array<i64: 2, 4>}]} {
    %c0_i32 = arith.constant 0 : i32
    %0 = arith.cmpi eq, %arg1, %c0_i32 : i32
    %1 = arith.extui %0 : i1 to i32
    %c0_i32_0 = arith.constant 0 : i32
    %2 = arith.cmpi ne, %1, %c0_i32_0 : i32
    scf.if %2 {
      %cst_9 = arith.constant 0.000000e+00 : f32
      %12 = vector.broadcast %cst_9 : f32 to vector<2x4xf32>
      %c0_10 = arith.constant 0 : index
      %c0_11 = arith.constant 0 : index
      %13 = vector.load %arg7[%c0_10, %c0_11] : memref<2x4xf32, #tpu.memory_space<vmem>>, vector<2x4xf32>
      tpu.vector_store %arg7[%c0_10, %c0_11], %12 {strides = array<i32>} : memref<2x4xf32, #tpu.memory_space<vmem>>, vector<2x4xf32>,
    } else {
    }
    %c0 = arith.constant 0 : index
    %c0_1 = arith.constant 0 : index
    %c0_2 = arith.constant 0 : index
    %3 = vector.load %arg2[%c0, %c0_1, %c0_2] : memref<2x4x1024xbf16, #tpu.memory_space<vmem>>, vector<2x4x1024xbf16>
    %4 = arith.extf %3 : vector<2x4x1024xbf16> to vector<2x4x1024xf32>
    %c0_3 = arith.constant 0 : index
    %c0_4 = arith.constant 0 : index
    %5 = vector.load %arg7[%c0_3, %c0_4] : memref<2x4xf32, #tpu.memory_space<vmem>>, vector<2x4xf32>
    %cst = arith.constant dense<0.000000e+00> : vector<2x4xf32>
    %6 = vector.multi_reduction <add>, %4, %cst [2] : vector<2x4x1024xf32> to vector<2x4xf32>
    %7 = arith.addf %5, %6 : vector<2x4xf32>
    %c0_5 = arith.constant 0 : index
    %c0_6 = arith.constant 0 : index
    %8 = vector.load %arg7[%c0_5, %c0_6] : memref<2x4xf32, #tpu.memory_space<vmem>>, vector<2x4xf32>
    tpu.vector_store %arg7[%c0_5, %c0_6], %7 {strides = array<i32>} : memref<2x4xf32, #tpu.memory_space<vmem>>, vector<2x4xf32>,
    %c0_i32_7 = arith.constant 0 : i32
    %9 = arith.cmpi eq, %arg1, %c0_i32_7 : i32
    %10 = arith.extui %9 : i1 to i32
    %c0_i32_8 = arith.constant 0 : i32
    %11 = arith.cmpi ne, %10, %c0_i32_8 : i32
    scf.if %11 {
      %c0_9 = arith.constant 0 : index
      %c0_10 = arith.constant 0 : index
      %12 = vector.load %arg7[%c0_9, %c0_10] : memref<2x4xf32, #tpu.memory_space<vmem>>, vector<2x4xf32>
      %cst_11 = arith.constant 9.765625E-4 : f32
      %13 = vector.broadcast %cst_11 : f32 to vector<2x4xf32>
      %14 = arith.mulf %12, %13 : vector<2x4xf32>
      %c0_12 = arith.constant 0 : index
      %c0_13 = arith.constant 0 : index
      %15 = vector.load %arg3[%c0_12, %c0_13] : memref<4x2xf32, #tpu.memory_space<vmem>>, vector<4x2xf32>
      %cst_14 = arith.constant dense<0.000000e+00> : vector<2x2xf32>
      %16 = tpu.matmul %14, %15, %cst_14 {dimension_numbers = #tpu.dot_dimension_numbers<[1], [0], [0], [1], [0, 0, 1, 1], [], []>} : vector<2x4xf32>, vector<4x2xf32>, vector<2x2xf32> -> vector<2x2xf32>
      %cst_15 = arith.constant 0.000000e+00 : f32
      %17 = vector.broadcast %cst_15 : f32 to vector<2x2xf32>
      %18 = arith.maximumf %16, %17 : vector<2x2xf32>
      %c0_16 = arith.constant 0 : index
      %c0_17 = arith.constant 0 : index
      %19 = vector.load %arg4[%c0_16, %c0_17] : memref<2x4xf32, #tpu.memory_space<vmem>>, vector<2x4xf32>
      %cst_18 = arith.constant dense<0.000000e+00> : vector<2x4xf32>
      %20 = tpu.matmul %18, %19, %cst_18 {dimension_numbers = #tpu.dot_dimension_numbers<[1], [0], [0], [1], [0, 0, 1, 1], [], []>} : vector<2x2xf32>, vector<2x4xf32>, vector<2x4xf32> -> vector<2x4xf32>
      %c0_19 = arith.constant 0 : index
      %c0_20 = arith.constant 0 : index
      %21 = vector.load %arg5[%c0_19, %c0_20] : memref<1x4xf32, #tpu.memory_space<vmem>>, vector<1x4xf32>
      %22 = vector.broadcast %21 : vector<1x4xf32> to vector<2x4xf32>
      %23 = arith.addf %20, %22 : vector<2x4xf32>
      %cst_21 = arith.constant 2.500000e-01 : f32
      %24 = vector.broadcast %cst_21 : f32 to vector<2x4xf32>
      %25 = arith.mulf %23, %24 : vector<2x4xf32>
      %cst_22 = arith.constant dense<0xFF800000> : vector<2xf32>
      %26 = vector.multi_reduction <maximumf>, %25, %cst_22 [1] : vector<2x4xf32> to vector<2xf32>
      %27 = vector.shape_cast %26 : vector<2xf32> to vector<2x1xf32>
      %28 = vector.broadcast %27 : vector<2x1xf32> to vector<2x4xf32>
      %29 = arith.subf %25, %28 : vector<2x4xf32>
      %30 = math.exp %29 : vector<2x4xf32>
      %cst_23 = arith.constant dense<0.000000e+00> : vector<2xf32>
      %31 = vector.multi_reduction <add>, %30, %cst_23 [1] : vector<2x4xf32> to vector<2xf32>
      %32 = vector.shape_cast %31 : vector<2xf32> to vector<2x1xf32>
      %33 = vector.broadcast %32 : vector<2x1xf32> to vector<2x4xf32>
      %34 = arith.divf %30, %33 : vector<2x4xf32>
      %c0_24 = arith.constant 0 : index
      %c0_25 = arith.constant 0 : index
      %35 = vector.load %arg6[%c0_24, %c0_25] : memref<2x4xf32, #tpu.memory_space<vmem>>, vector<2x4xf32>
      tpu.vector_store %arg6[%c0_24, %c0_25], %34 {strides = array<i32>} : memref<2x4xf32, #tpu.memory_space<vmem>>, vector<2x4xf32>,
    } else {
    }
    return
  }
  func.func @transform_0(%arg0: i32, %arg1: i32) -> (i32, i32, i32) {
    %c0_i32 = arith.constant 0 : i32
    %c0_i32_0 = arith.constant 0 : i32
    return %arg0, %c0_i32, %arg1 : i32, i32, i32
  }
  func.func @transform_1(%arg0: i32, %arg1: i32) -> (i32, i32) {
    %c0_i32 = arith.constant 0 : i32
    %c0_i32_0 = arith.constant 0 : i32
    %c0_i32_1 = arith.constant 0 : i32
    return %c0_i32, %c0_i32_0 : i32, i32
  }
  func.func @transform_2(%arg0: i32, %arg1: i32) -> (i32, i32) {
    %c0_i32 = arith.constant 0 : i32
    %c0_i32_0 = arith.constant 0 : i32
    %c0_i32_1 = arith.constant 0 : i32
    return %c0_i32, %c0_i32_0 : i32, i32
  }
  func.func @transform_3(%arg0: i32, %arg1: i32) -> (i32, i32) {
    %c0_i32 = arith.constant 0 : i32
    %c0_i32_0 = arith.constant 0 : i32
    %c0_i32_1 = arith.constant 0 : i32
    return %c0_i32, %c0_i32_0 : i32, i32
  }
  func.func @transform_4(%arg0: i32, %arg1: i32) -> (i32, i32) {
    %c0_i32 = arith.constant 0 : i32
    %c0_i32_0 = arith.constant 0 : i32
    return %arg0, %c0_i32 : i32, i32
  }
}

</mosaic_0001>

<bundles_post_ra>
// kernel: tpu_custom_call.1
= control target key start
LH: loop header
LB: loop body
LE: loop exit
PB: predicated region body
PF: predicated region fallthrough
CT: control target
= control target key end

     0   :  { %9 = vsyncpa [#allocation4], 0  ;;  %s489_s0 = inlined_call_operand.hbm [shape: bf16[2,4,1024], index: 0, kind: input, shape index: {}]   ;;  %s490_s1 = inlined_call_operand.vmem [shape: f32[4,2], index: 1, kind: input, shape index: {}]   ;;  %s491_s2 = inlined_call_operand.vmem [shape: f32[2,4], index: 2, kind: input, shape index: {}]   ;;  %s492_s3 = inlined_call_operand.vmem [shape: f32[1,4], index: 3, kind: input, shape index: {}]   ;;  %s493_s4 = inlined_call_operand.hbm [shape: f32[2,4], index: 4, kind: output, shape index: {}]  }
   0x1   :  { %10 = vsyncpa [#allocation5], 0  ;;  %s403_s15 = smov [#allocation3]   ;;  %s355_s19 = scalar_lea.hbm %s489_s0, 512 }
   0x2   :  { %s16_s16 = sshll.u32 %s403_s15, 4  ;;  %p356_p0 = scmp.ne.s32.totalorder %s489_s0, %s355_s19  ;;  %s17_s16 = int_to_ptr.vmem [resolvable:$true] %s16_s16 }
   0x3   :  { %p359_p1 = scmp.lt.u32.totalorder %s355_s19, %s489_s0 }
   0x5   :  { %p361_p2 = pnand %p359_p1, %p356_p0 }
   0x7   :  { %364 = shalt.err (!%p361_p2)
}
   0x8   :  { %s365_s24 = scalar_lea.vmem %s17_s16, 512  ;;  %p370_p4 = scmp.lt.s32.totalorder %s17_s16, %s17_s16 }
   0x9   :  { %p366_p3 = scmp.ne.s32.totalorder %s17_s16, %s365_s24  ;;  %p371_p5 = scmp.lt.s32.totalorder %s365_s24, %s365_s24 }
   0xb   :  { %p372_p6 = por %p371_p5, %p370_p4 }
   0xd   :  { %p373_p7 = pnand %p372_p6, %p366_p3 }
   0xf   :  { %376 = shalt.err (!%p373_p7)
}
  0x10   :  { %s404_s25 = smov 256   ;;  %s405_s26 = smov 16  }
  0x11   :  { %22 = dma.hbm_to_vmem [thread:$0]  %s489_s0, 512, %s17_s16, [#allocation4], %s404_s25, %s404_s25, %s405_s26  }
  0x12   :  { %399 = dma.done.wait [#allocation4], 512  }
  0x13   :  { %400 = vsyncadd [#allocation4], 4294966784  ;;  %v38_v0 = vld [vmem:[#allocation3] sm:$0xff]  ;;  %v39_v1 = vld [vmem:[#allocation3 + $0x8] sm:$0xff]  ;;  %vm75_vm0 = vcmask 1043456   ;;  %vm36_vm1 = vcmask 25600   ;;  %v112_v52 = vlaneseq }
  0x14   :  { %v40_v2 = vld [vmem:[#allocation3 + $0x10] sm:$0xff]  ;;  %v42_v3 = vunpack.c.l.bf16 %v38_v0  ;;  %v43_v4 = vunpack.c.h.bf16 %v38_v0  ;;  %v44_v7 = vunpack.c.l.bf16 %v39_v1  ;;  %v41_v10 = vld [vmem:[#allocation3 + $0x18] sm:$0xff]  ;;  %v45_v18 = vunpack.c.h.bf16 %v39_v1 }
  0x15   :  { %v46_v5 = vunpack.c.l.bf16 %v40_v2  ;;  %v47_v6 = vunpack.c.h.bf16 %v40_v2  ;;  %v48_v15 = vunpack.c.l.bf16 %v41_v10  ;;  %v49_v28 = vunpack.c.h.bf16 %v41_v10  ;;  %v133_v51 = vld [vmem:[%s490_s1] sm:$0xf] }
  0x16   :  { %v59_v8 = vcombine.high %v42_v3, %v42_v3  ;;  %v60_v9 = vcombine.high %v43_v4, %v43_v4  ;;  %v76_v11 = vsel %vm75_vm0, %v42_v3, 0.0  ;;  %v79_v13 = vsel %vm75_vm0, %v43_v4, 0.0  ;;  %v212_v1 = vld [vmem:[%s491_s2] sm:$0x3]  ;;  %s408_s2 = smov [#allocation6]  }
  0x17   :  { %v63_v16 = vcombine.high %v46_v5, %v46_v5  ;;  %v64_v17 = vcombine.high %v47_v6, %v47_v6  ;;  %v61_v19 = vcombine.high %v44_v7, %v44_v7  ;;  %v93_v21 = vsel %vm75_vm0, %v46_v5, 0.0  ;;  %v328_v5 = vld [vmem:[%s492_s3] ss:$0 sm:$0xff]  ;;  %s317_s7 = sshll.u32 %s408_s2, 4  ;;  %s318_s7 = int_to_ptr.vmem [resolvable:$true] %s317_s7 }
  0x18   :  { %v77_v12 = vsel %vm75_vm0, %v59_v8, 0.0  ;;  %v81_v20 = vsel %vm75_vm0, %v60_v9, 0.0  ;;  %v96_v24 = vsel %vm75_vm0, %v47_v6, 0.0  ;;  %v83_v25 = vsel %vm75_vm0, %v44_v7, 0.0  ;;  %s377_s3 = scalar_lea.vmem %s318_s7, 32  ;;  %p382_p9 = scmp.lt.s32.totalorder %s318_s7, %s318_s7 }
  0x19   :  { %v78_v14 = vadd.f32 %v77_v12, %v76_v11  ;;  %v94_v23 = vsel %vm75_vm0, %v63_v16, 0.0  ;;  %v65_v29 = vcombine.high %v48_v15, %v48_v15  ;;  %v98_v30 = vsel %vm75_vm0, %v64_v17, 0.0  ;;  %p378_p8 = scmp.ne.s32.totalorder %s318_s7, %s377_s3  ;;  %p383_p10 = scmp.lt.s32.totalorder %s377_s3, %s377_s3 }
  0x1a   :  { %v95_v26 = vadd.f32 %v94_v23, %v93_v21  ;;  %v62_v31 = vcombine.high %v45_v18, %v45_v18  ;;  %v85_v32 = vsel %vm75_vm0, %v61_v19, 0.0  ;;  %v100_v35 = vsel %vm75_vm0, %v48_v15, 0.0 }
  0x1b   :  { %v80_v22 = vadd.f32 %v79_v13, %v78_v14  ;;  %v87_v36 = vsel %vm75_vm0, %v45_v18, 0.0  ;;  %v66_v39 = vcombine.high %v49_v28, %v49_v28  ;;  %v102_v40 = vsel %vm75_vm0, %v65_v29, 0.0  ;;  %p384_p11 = por %p383_p10, %p382_p9 }
  0x1c   :  { %v97_v33 = vadd.f32 %v96_v24, %v95_v26  ;;  %v89_v41 = vsel %vm75_vm0, %v62_v31, 0.0  ;;  %v104_v44 = vsel %vm75_vm0, %v49_v28, 0.0  ;;  %v406_v50 = vmov 0.0  }
  0x1d   :  { %v82_v27 = vadd.f32 %v81_v20, %v80_v22  ;;  %v106_v47 = vsel %vm75_vm0, %v66_v39, 0.0  ;;  %37 = vst.msk [vmem:[#allocation2] sm:$0x3] %vm36_vm1, %v406_v50  ;;  %335 = vmatprep.subr.mxu0 %v406_v50  ;;  %340 = vmatprep.subr.mxu1 %v406_v50  ;;  %vm407_vm2 = vmmov 0   ;;  %v113_v53 = vand.u32 127, %v112_v52  ;;  %p385_p12 = pnand %p384_p11, %p378_p8 }
  0x1e   :  { %v99_v37 = vadd.f32 %v98_v30, %v97_v33  ;;  %336 = vmatpush3.msk.msra.mxu0 %vm75_vm0, %v133_v51  ;;  %337 = vmatprep.mubr.msk.f32.mxu0 %vm407_vm2, %v406_v50  ;;  %v115_v54 = vshrl.u32 %v112_v52, 7  ;;  %vm122_vm3 = vcmask 1041409   ;;  %vm134_vm4 = vcmask 31744  }
  0x1f   :  { %v84_v34 = vadd.f32 %v83_v25, %v82_v27  ;;  %342 = vmatprep.mubr.msk.f32.mxu1 %vm407_vm2, %v406_v50  ;;  %vm224_vm5 = vcmask 1041408   ;;  %vm220_vm6 = vcmask 15360  }
  0x20   :  { %v101_v42 = vadd.f32 %v100_v35, %v99_v37  ;;  %v116_v56 = vsub.s32 %v113_v53, %v115_v54  ;;  %341 = vmatpush3.msk.msra.mxu1 %vm224_vm5, %v212_v1 }
  0x21   :  { %v86_v38 = vadd.f32 %v85_v32, %v84_v34 }
  0x22   :  { %v103_v45 = vadd.f32 %v102_v40, %v101_v42 }
  0x23   :  { %v88_v43 = vadd.f32 %v87_v36, %v86_v38 }
  0x24   :  { %v105_v48 = vadd.f32 %v104_v44, %v103_v45  ;;  %v50_v60 = vld [vmem:[#allocation2] sm:$0x3] }
  0x25   :  { %v90_v46 = vadd.f32 %v89_v41, %v88_v43 }
  0x26   :  { %v107_v49 = vadd.f32 %v106_v47, %v105_v48 }
  0x27   :  { %91 = vadd.xlane.f32.xlu0 %v90_v46 }
  0x2b   :  { %108 = vadd.xlane.f32.xlu0 %v107_v49 }
  0xb4   :  { %v92_v55 = vpop.xlane.xlu0 %91 }
  0xb5   :  { %v117_v58 = vrot.slane %v92_v55, %v116_v56 }
  0xb8   :  { %v109_v57 = vpop.xlane.xlu0 %108 }
  0xb9   :  { %v121_v59 = vrot.slane %v109_v57, %v116_v56 }
  0xbb   :  { %v123_v61 = vsel %vm122_vm3, %v121_v59, %v117_v58 }
  0xbc   :  { %v125_v62 = vadd.f32 %v123_v61, %v50_v60 }
  0xbe   :  { %127 = vst.msk [vmem:[#allocation2] sm:$0x3] %vm36_vm1, %v125_v62 }
  0xc5   :  { %v131_v63 = vld [vmem:[#allocation2] sm:$0x3] }
  0xc6   :  { %v132_v0 = vmul.f32 0.0009765625, %v131_v63 }
  0xc8   :  { %338 = vmatmul.mubr.msk.f32.vlgmr.msra.gmra.mrb[0].mxu0 %vm134_vm4, %v132_v0 }
 0x19b   :  { %v207_v2 = vpop.f32.mrb[0].mxu0 }
 0x19c   :  { %v211_v3 = vmax.f32 %v207_v2, 0.0  ;;  %v339_v4 = vpop.f32.mrb[1].mxu0 }
 0x19e   :  { %343 = vmatmul.mubr.msk.f32.vlgmr.msra.gmra.mrb[0].mxu1 %vm220_vm6, %v211_v3 }
 0x271   :  { %v294_v6 = vpop.f32.mrb[0].mxu1 }
 0x272   :  { %v295_v7 = vadd.f32 %v328_v5, %v294_v6  ;;  %v344_v8 = vpop.f32.mrb[1].mxu1 }
 0x274   :  { %v298_v9 = vmul.f32 0.25, %v295_v7 }
 0x276   :  { %v299_v10 = vsel %vm36_vm1, %v298_v9, -inf }
 0x277   :  { %300 = vmax.xlane.f32.xlu1 %v299_v10 }
 0x304   :  { %v301_v11 = vpop.xlane.xlu1 %300 }
 0x305   :  { %v302_v12 = vsub.f32 %v298_v9, %v301_v11 }
 0x307   :  { %v303_v13 = vmul.f32 1.442695, %v302_v12 }
 0x309   :  { %351 = vpow2.f32 %v303_v13 }
 0x313   :  { %v352_v14 = vpop.eup %351 }
 0x314   :  { %v305_v15 = vsel %vm36_vm1, %v352_v14, 0.0 }
 0x315   :  { %306 = vadd.xlane.f32.xlu1 %v305_v15 }
 0x3a2   :  { %v307_v16 = vpop.xlane.xlu1 %306 }
 0x3a3   :  { %353 = vrcp.f32 %v307_v16 }
 0x3ad   :  { %v354_v17 = vpop.eup %353 }
 0x3ae   :  { %v309_v18 = vmul.f32 %v354_v17, %v352_v14 }
 0x3b0   :  { %310 = vst.msk [vmem:[#allocation6] sm:$0x3] %vm36_vm1, %v309_v18 }
 0x3b1   :  { %388 = shalt.err (!%p385_p12)
}
 0x3b2   :  { %s389_s10 = scalar_lea.hbm %s493_s4, 32 }
 0x3b3   :  { %p390_p13 = scmp.ne.s32.totalorder %s493_s4, %s389_s10  ;;  %p393_p0 = scmp.lt.u32.totalorder %s389_s10, %s493_s4 }
 0x3b5   :  { %p395_p1 = pnand %p393_p0, %p390_p13 }
 0x3b7   :  { %398 = shalt.err (!%p395_p1)
}
 0x3b8   :  { %320 = dma.vmem_to_hbm [thread:$0]  %s318_s7, 32, %s493_s4, [#allocation5]  }
 0x3b9   :  { %401 = dma.done.wait [#allocation5], 32  }
 0x3ba   :  { %402 = vsyncadd [#allocation5], 4294967264 }
 0x3bb   :  { %324 = vsyncpa [#allocation4], 1 }
 0x3bc   :  { %325 = vsyncpa [#allocation5], 1 }

</bundles_post_ra>
